<compile_context>
chip_gen: v7x
topology: tpu7x:2x2x1
jax: 0.10.0
libtpu: 0.0.40
codegen_flags: <defaults>
</compile_context>

<pallas_src>
import math

import jax
import jax.numpy as jnp
from jax.experimental import pallas as pl
from jax.experimental.pallas import tpu as pltpu

LANE = 128       # lane width: last-dim padding unit for weights / output
ROW_TILE = 16    # batch-tile granularity (bf16 packs 16 rows per vreg)


def _round_up(n, m):
    return ((n + m - 1) // m) * m


def _cdiv(a, b):
    return (a + b - 1) // b


def _vmem_capacity_bytes():
    """Per-core VMEM capacity; conservative 64 MiB (v7x per-TC) if the query fails."""
    try:
        info = pltpu.get_tpu_info()
        cap = int(getattr(info, "vmem_capacity_bytes", 0))
        if cap > 0:
            return cap
    except Exception:
        pass
    return 64 * 1024 * 1024


def _working_set_bytes(tb, dims_pad, weight_buffers=2):
    """Rough per-core VMEM working-set estimate for a given batch tile (conservative:
    assumes double-buffered weights so the non-Buffered(1) fallback also fits)."""
    w_bytes = sum(ip * op * 2 for ip, op in zip(dims_pad[:-1], dims_pad[1:]))
    b_bytes = sum(op * 4 for op in dims_pad[1:])
    resident = (w_bytes + b_bytes) * weight_buffers
    x_tiles = 2 * tb * dims_pad[0] * 4          # double-buffered f32 input tiles
    o_tiles = 2 * tb * dims_pad[-1] * 2         # double-buffered bf16 output tiles
    live = tb * max(dims_pad) * 12              # f32 y + bf16 h + compiler scratch slack
    return resident + x_tiles + o_tiles + live


def _make_fused_mlp_kernel(num_layers, compute_dtype):
    """Fused kernel: refs = (x, w1, b1, ..., wL, bL, out). One batch tile per call."""

    def kernel(*refs):
        x_ref = refs[0]
        o_ref = refs[-1]
        wb = refs[1:-1]

        h = x_ref[...].astype(compute_dtype)            # f32 HBM -> bf16 MXU input, in-kernel
        for l in range(num_layers):
            w = wb[2 * l][...]                          # (in_pad, out_pad), bf16
            b = wb[2 * l + 1][...]                      # (1, out_pad), f32 -> broadcasts
            y = jnp.dot(h, w, preferred_element_type=jnp.float32) + b
            if l < num_layers - 1:
                # cast-then-ReLU == ReLU-then-cast bitwise; native bf16 VALU on v6e/v7x.
                h = jnp.maximum(y.astype(compute_dtype), 0)
            else:
                h = jax.nn.sigmoid(y)                   # sigmoid in f32 (EUP)
        o_ref[...] = h.astype(o_ref.dtype)

    return kernel


def net_catalyst_forward(x, params, *, batch_tile=1024, compute_dtype=jnp.bfloat16):
    """Forward pass: ReLU on all hidden layers, sigmoid on the last layer.

    x:      (B, in) float32
    params: list of (W, b) with W (in, out) f32, b (out,) f32
    Returns (B, out_last) float32.
    """
    B, in_dim = x.shape
    num_layers = len(params)

    # Feature sizes at every layer boundary. The input keeps its native width (the block
    # spans the full dim, so x needs no feature-padding copy); every layer OUTPUT is
    # padded to 128 lanes for lane-dense stores and full MXU tiles.
    dims = [in_dim] + [w.shape[1] for w, _ in params]
    dims_pad = [in_dim] + [_round_up(max(d, 1), LANE) for d in dims[1:]]

    # ---- batch tiling -----------------------------------------------------------------
    b_rows = _round_up(B, ROW_TILE)
    tb = min(_round_up(batch_tile, ROW_TILE), b_rows)
    if b_rows >= 2 * ROW_TILE:
        # at least 2 batch tiles so the "parallel" grid axis feeds both v7x TensorCores
        tb = min(tb, _round_up(_cdiv(b_rows, 2), ROW_TILE))

    vmem_cap = _vmem_capacity_bytes()
    vmem_budget = vmem_cap * 3 // 4             # headroom for compiler scratch / spills
    while tb > ROW_TILE and _working_set_bytes(tb, dims_pad) > vmem_budget:
        tb = _round_up(tb // 2, ROW_TILE)
    # TODO(synk): if the resident bf16 weight set alone exceeds the per-core VMEM budget
    # (very wide layers, esp. v7x 64 MiB/TC), tile the widest layer's output dim with an
    # extra "arbitrary" grid axis instead of keeping every weight resident.

    # rebalance the tile so batch padding overshoot is < ROW_TILE rows per tile
    num_tiles = _cdiv(b_rows, tb)
    tb = _round_up(_cdiv(b_rows, num_tiles), ROW_TILE)
    bp = num_tiles * tb

    # ---- inputs -------------------------------------------------------------------------
    # x stays f32 and un-copied when bp == B; otherwise only row-pad (no feature padding,
    # no wrapper-side bf16 round trip — the cast happens inside the kernel).
    x_dev = x if bp == B else jnp.pad(x, ((0, bp - B), (0, 0)))

    fused_inputs = [x_dev]
    for l, (w, b) in enumerate(params):
        ip, op = dims_pad[l], dims_pad[l + 1]
        if tuple(w.shape) == (ip, op):
            w_pad = w.astype(compute_dtype)
        else:
            w_pad = jnp.zeros((ip, op), compute_dtype)
            w_pad = w_pad.at[: w.shape[0], : w.shape[1]].set(w.astype(compute_dtype))
        b_pad = jnp.zeros((1, op), jnp.float32)
        b_pad = b_pad.at[0, : b.shape[0]].set(b.astype(jnp.float32))
        fused_inputs += [w_pad, b_pad]

    out_pad = dims_pad[-1]
    kernel = _make_fused_mlp_kernel(num_layers, compute_dtype)
    vmem_limit = int(max(vmem_budget, 32 * 1024 * 1024))

    def call(single_buffer_weights):
        wb_kwargs = {"pipeline_mode": pl.Buffered(1)} if single_buffer_weights else {}
        in_specs = [pl.BlockSpec((tb, dims_pad[0]), lambda i: (i, 0))]
        for l in range(num_layers):
            ip, op = dims_pad[l], dims_pad[l + 1]
            # constant index_map -> weights/biases stay VMEM-resident across batch tiles
            in_specs.append(pl.BlockSpec((ip, op), lambda i: (0, 0), **wb_kwargs))
            in_specs.append(pl.BlockSpec((1, op), lambda i: (0, 0), **wb_kwargs))
        return pl.pallas_call(
            kernel,
            out_shape=jax.ShapeDtypeStruct((bp, out_pad), jnp.bfloat16),
            grid=(bp // tb,),
            in_specs=in_specs,
            out_specs=pl.BlockSpec((tb, out_pad), lambda i: (i, 0)),
            compiler_params=pltpu.CompilerParams(
                dimension_semantics=("parallel",),   # megacore on v7x, no-op on v5e/v6e
                vmem_limit_bytes=vmem_limit,
            ),
        )(*fused_inputs)

    try:
        y_pad = call(True)     # single-buffered resident weights (half the weight VMEM)
    except Exception:
        y_pad = call(False)    # fallback: default (double-buffered) specs

    # Slice off batch / lane padding and restore f32 for the caller.
    return y_pad[:B, : dims[-1]].astype(jnp.float32)


def init_params(layers, key):
    """Deterministic init matching the PyTorch module's shapes.

    Weight: kaiming_uniform_(nonlinearity='relu') -> U(-sqrt(6/fan_in), +sqrt(6/fan_in))
    Bias:   nn.Linear default                     -> U(-1/sqrt(fan_in), +1/sqrt(fan_in))
    Weights stored as (in, out) = W^T of the PyTorch (out, in) layout.
    """
    params = []
    for in_size, out_size in zip(layers, layers[1:]):
        key, kw, kb = jax.random.split(key, 3)
        w_bound = math.sqrt(6.0 / in_size)
        b_bound = 1.0 / math.sqrt(in_size)
        w = jax.random.uniform(kw, (in_size, out_size), jnp.float32,
                               minval=-w_bound, maxval=w_bound)
        b = jax.random.uniform(kb, (out_size,), jnp.float32,
                               minval=-b_bound, maxval=b_bound)
        params.append((w, b))
    return params


def _reference_forward(x, params):
    """Pure-JAX f32 reference for correctness checking."""
    h = x
    L = len(params)
    for l, (w, b) in enumerate(params):
        h = h @ w + b
        h = jnp.maximum(h, 0.0) if l < L - 1 else jax.nn.sigmoid(h)
    return h


if __name__ == "__main__":
    key = jax.random.PRNGKey(0)

    # Config 1: small ragged shapes (exercises row-padding + lane-padding of weights).
    Layers = [16, 32, 16, 1]
    batch = 8
    key, kx, kp = jax.random.split(key, 3)
    x = jax.random.normal(kx, (batch, Layers[0]), jnp.float32)
    params = init_params(Layers, kp)

    y = jax.block_until_ready(net_catalyst_forward(x, params))
    assert y.shape == (batch, Layers[-1])
    assert bool(jnp.all((y >= 0.0) & (y <= 1.0)))          # sigmoid range sanity check
    y_ref = _reference_forward(x, params)
    err = float(jnp.max(jnp.abs(y - y_ref)))
    assert err < 5e-2, f"config1 max abs error {err}"

    # Config 2: lane-aligned shapes (exercises the zero-copy x path + 2 batch tiles).
    Layers2 = [128, 256, 1]
    batch2 = 64
    key, kx2, kp2 = jax.random.split(key, 3)
    x2 = jax.random.normal(kx2, (batch2, Layers2[0]), jnp.float32)
    params2 = init_params(Layers2, kp2)

    y2 = jax.block_until_ready(net_catalyst_forward(x2, params2))
    assert y2.shape == (batch2, Layers2[-1])
    assert bool(jnp.all((y2 >= 0.0) & (y2 <= 1.0)))
    y2_ref = _reference_forward(x2, params2)
    err2 = float(jnp.max(jnp.abs(y2 - y2_ref)))
    assert err2 < 5e-2, f"config2 max abs error {err2}"

    print("KERNEL_OK")
</pallas_src>

<mosaic_0001>
module attributes {stable_mosaic.version = 11 : i64} {
  func.func @kernel(%arg0: i32, %arg1: memref<16x16xf32, #tpu.memory_space<vmem>>, %arg2: memref<16x128xbf16, #tpu.memory_space<vmem>>, %arg3: memref<1x128xf32, #tpu.memory_space<vmem>>, %arg4: memref<128x128xbf16, #tpu.memory_space<vmem>>, %arg5: memref<1x128xf32, #tpu.memory_space<vmem>>, %arg6: memref<128x128xbf16, #tpu.memory_space<vmem>>, %arg7: memref<1x128xf32, #tpu.memory_space<vmem>>, %arg8: memref<16x128xbf16, #tpu.memory_space<vmem>>) attributes {dimension_semantics = [#tpu.dimension_semantics<parallel>], iteration_bounds = array<i64: 1>, scalar_prefetch = 0 : i64, scratch_operands = 0 : i64, tpu.core_type = #tpu.core_type<tc>, window_params = [{transform_indices = @transform_0, window_bounds = array<i64: 16, 16>}, {pipeline_mode = #tpu.pipeline_mode<synchronous>, transform_indices = @transform_1, window_bounds = array<i64: 16, 128>}, {pipeline_mode = #tpu.pipeline_mode<synchronous>, transform_indices = @transform_2, window_bounds = array<i64: 1, 128>}, {pipeline_mode = #tpu.pipeline_mode<synchronous>, transform_indices = @transform_3, window_bounds = array<i64: 128, 128>}, {pipeline_mode = #tpu.pipeline_mode<synchronous>, transform_indices = @transform_4, window_bounds = array<i64: 1, 128>}, {pipeline_mode = #tpu.pipeline_mode<synchronous>, transform_indices = @transform_5, window_bounds = array<i64: 128, 128>}, {pipeline_mode = #tpu.pipeline_mode<synchronous>, transform_indices = @transform_6, window_bounds = array<i64: 1, 128>}, {transform_indices = @transform_7, window_bounds = array<i64: 16, 128>}]} {
    %c0 = arith.constant 0 : index
    %c0_0 = arith.constant 0 : index
    %0 = vector.load %arg1[%c0, %c0_0] : memref<16x16xf32, #tpu.memory_space<vmem>>, vector<16x16xf32>
    %1 = arith.truncf %0 : vector<16x16xf32> to vector<16x16xbf16>
    %c0_1 = arith.constant 0 : index
    %c0_2 = arith.constant 0 : index
    %2 = vector.load %arg2[%c0_1, %c0_2] : memref<16x128xbf16, #tpu.memory_space<vmem>>, vector<16x128xbf16>
    %c0_3 = arith.constant 0 : index
    %c0_4 = arith.constant 0 : index
    %3 = vector.load %arg3[%c0_3, %c0_4] : memref<1x128xf32, #tpu.memory_space<vmem>>, vector<1x128xf32>
    %cst = arith.constant dense<0.000000e+00> : vector<16x128xf32>
    %4 = tpu.matmul %1, %2, %cst {dimension_numbers = #tpu.dot_dimension_numbers<[1], [0], [0], [1], [0, 0, 1, 1], [], []>} : vector<16x16xbf16>, vector<16x128xbf16>, vector<16x128xf32> -> vector<16x128xf32>
    %5 = vector.broadcast %3 : vector<1x128xf32> to vector<16x128xf32>
    %6 = arith.addf %4, %5 : vector<16x128xf32>
    %7 = arith.truncf %6 : vector<16x128xf32> to vector<16x128xbf16>
    %cst_5 = arith.constant 0.000000e+00 : bf16
    %8 = vector.broadcast %cst_5 : bf16 to vector<16x128xbf16>
    %9 = arith.maximumf %7, %8 : vector<16x128xbf16>
    %c0_6 = arith.constant 0 : index
    %c0_7 = arith.constant 0 : index
    %10 = vector.load %arg4[%c0_6, %c0_7] : memref<128x128xbf16, #tpu.memory_space<vmem>>, vector<128x128xbf16>
    %c0_8 = arith.constant 0 : index
    %c0_9 = arith.constant 0 : index
    %11 = vector.load %arg5[%c0_8, %c0_9] : memref<1x128xf32, #tpu.memory_space<vmem>>, vector<1x128xf32>
    %cst_10 = arith.constant dense<0.000000e+00> : vector<16x128xf32>
    %12 = tpu.matmul %9, %10, %cst_10 {dimension_numbers = #tpu.dot_dimension_numbers<[1], [0], [0], [1], [0, 0, 1, 1], [], []>} : vector<16x128xbf16>, vector<128x128xbf16>, vector<16x128xf32> -> vector<16x128xf32>
    %13 = vector.broadcast %11 : vector<1x128xf32> to vector<16x128xf32>
    %14 = arith.addf %12, %13 : vector<16x128xf32>
    %15 = arith.truncf %14 : vector<16x128xf32> to vector<16x128xbf16>
    %cst_11 = arith.constant 0.000000e+00 : bf16
    %16 = vector.broadcast %cst_11 : bf16 to vector<16x128xbf16>
    %17 = arith.maximumf %15, %16 : vector<16x128xbf16>
    %c0_12 = arith.constant 0 : index
    %c0_13 = arith.constant 0 : index
    %18 = vector.load %arg6[%c0_12, %c0_13] : memref<128x128xbf16, #tpu.memory_space<vmem>>, vector<128x128xbf16>
    %c0_14 = arith.constant 0 : index
    %c0_15 = arith.constant 0 : index
    %19 = vector.load %arg7[%c0_14, %c0_15] : memref<1x128xf32, #tpu.memory_space<vmem>>, vector<1x128xf32>
    %cst_16 = arith.constant dense<0.000000e+00> : vector<16x128xf32>
    %20 = tpu.matmul %17, %18, %cst_16 {dimension_numbers = #tpu.dot_dimension_numbers<[1], [0], [0], [1], [0, 0, 1, 1], [], []>} : vector<16x128xbf16>, vector<128x128xbf16>, vector<16x128xf32> -> vector<16x128xf32>
    %21 = vector.broadcast %19 : vector<1x128xf32> to vector<16x128xf32>
    %22 = arith.addf %20, %21 : vector<16x128xf32>
    %23 = arith.negf %22 : vector<16x128xf32>
    %24 = math.exp %23 : vector<16x128xf32>
    %cst_17 = arith.constant 1.000000e+00 : f32
    %25 = vector.broadcast %cst_17 : f32 to vector<16x128xf32>
    %26 = arith.addf %25, %24 : vector<16x128xf32>
    %27 = arith.divf %25, %26 : vector<16x128xf32>
    %28 = arith.truncf %27 : vector<16x128xf32> to vector<16x128xbf16>
    %c0_18 = arith.constant 0 : index
    %c0_19 = arith.constant 0 : index
    %29 = vector.load %arg8[%c0_18, %c0_19] : memref<16x128xbf16, #tpu.memory_space<vmem>>, vector<16x128xbf16>
    tpu.vector_store %arg8[%c0_18, %c0_19], %28 {strides = array<i32>} : memref<16x128xbf16, #tpu.memory_space<vmem>>, vector<16x128xbf16>,
    return
  }
  func.func @transform_0(%arg0: i32) -> (i32, i32) {
    %c0_i32 = arith.constant 0 : i32
    %c0_i32_0 = arith.constant 0 : i32
    return %arg0, %c0_i32 : i32, i32
  }
  func.func @transform_1(%arg0: i32) -> (i32, i32) {
    %c0_i32 = arith.constant 0 : i32
    %c0_i32_0 = arith.constant 0 : i32
    %c0_i32_1 = arith.constant 0 : i32
    return %c0_i32, %c0_i32_0 : i32, i32
  }
  func.func @transform_2(%arg0: i32) -> (i32, i32) {
    %c0_i32 = arith.constant 0 : i32
    %c0_i32_0 = arith.constant 0 : i32
    %c0_i32_1 = arith.constant 0 : i32
    return %c0_i32, %c0_i32_0 : i32, i32
  }
  func.func @transform_3(%arg0: i32) -> (i32, i32) {
    %c0_i32 = arith.constant 0 : i32
    %c0_i32_0 = arith.constant 0 : i32
    %c0_i32_1 = arith.constant 0 : i32
    return %c0_i32, %c0_i32_0 : i32, i32
  }
  func.func @transform_4(%arg0: i32) -> (i32, i32) {
    %c0_i32 = arith.constant 0 : i32
    %c0_i32_0 = arith.constant 0 : i32
    %c0_i32_1 = arith.constant 0 : i32
    return %c0_i32, %c0_i32_0 : i32, i32
  }
  func.func @transform_5(%arg0: i32) -> (i32, i32) {
    %c0_i32 = arith.constant 0 : i32
    %c0_i32_0 = arith.constant 0 : i32
    %c0_i32_1 = arith.constant 0 : i32
    return %c0_i32, %c0_i32_0 : i32, i32
  }
  func.func @transform_6(%arg0: i32) -> (i32, i32) {
    %c0_i32 = arith.constant 0 : i32
    %c0_i32_0 = arith.constant 0 : i32
    %c0_i32_1 = arith.constant 0 : i32
    return %c0_i32, %c0_i32_0 : i32, i32
  }
  func.func @transform_7(%arg0: i32) -> (i32, i32) {
    %c0_i32 = arith.constant 0 : i32
    %c0_i32_0 = arith.constant 0 : i32
    return %arg0, %c0_i32 : i32, i32
  }
}

module attributes {stable_mosaic.version = 11 : i64} {
  func.func @kernel(%arg0: i32, %arg1: memref<16x16xf32, #tpu.memory_space<vmem>>, %arg2: memref<16x128xbf16, #tpu.memory_space<vmem>>, %arg3: memref<1x128xf32, #tpu.memory_space<vmem>>, %arg4: memref<128x128xbf16, #tpu.memory_space<vmem>>, %arg5: memref<1x128xf32, #tpu.memory_space<vmem>>, %arg6: memref<128x128xbf16, #tpu.memory_space<vmem>>, %arg7: memref<1x128xf32, #tpu.memory_space<vmem>>, %arg8: memref<16x128xbf16, #tpu.memory_space<vmem>>) attributes {dimension_semantics = [#tpu.dimension_semantics<parallel>], iteration_bounds = array<i64: 1>, scalar_prefetch = 0 : i64, scratch_operands = 0 : i64, tpu.core_type = #tpu.core_type<tc>, window_params = [{transform_indices = @transform_0, window_bounds = array<i64: 16, 16>}, {pipeline_mode = #tpu.pipeline_mode<synchronous>, transform_indices = @transform_1, window_bounds = array<i64: 16, 128>}, {pipeline_mode = #tpu.pipeline_mode<synchronous>, transform_indices = @transform_2, window_bounds = array<i64: 1, 128>}, {pipeline_mode = #tpu.pipeline_mode<synchronous>, transform_indices = @transform_3, window_bounds = array<i64: 128, 128>}, {pipeline_mode = #tpu.pipeline_mode<synchronous>, transform_indices = @transform_4, window_bounds = array<i64: 1, 128>}, {pipeline_mode = #tpu.pipeline_mode<synchronous>, transform_indices = @transform_5, window_bounds = array<i64: 128, 128>}, {pipeline_mode = #tpu.pipeline_mode<synchronous>, transform_indices = @transform_6, window_bounds = array<i64: 1, 128>}, {transform_indices = @transform_7, window_bounds = array<i64: 16, 128>}]} {
    %c0 = arith.constant 0 : index
    %c0_0 = arith.constant 0 : index
    %0 = vector.load %arg1[%c0, %c0_0] : memref<16x16xf32, #tpu.memory_space<vmem>>, vector<16x16xf32>
    %1 = arith.truncf %0 : vector<16x16xf32> to vector<16x16xbf16>
    %c0_1 = arith.constant 0 : index
    %c0_2 = arith.constant 0 : index
    %2 = vector.load %arg2[%c0_1, %c0_2] : memref<16x128xbf16, #tpu.memory_space<vmem>>, vector<16x128xbf16>
    %c0_3 = arith.constant 0 : index
    %c0_4 = arith.constant 0 : index
    %3 = vector.load %arg3[%c0_3, %c0_4] : memref<1x128xf32, #tpu.memory_space<vmem>>, vector<1x128xf32>
    %cst = arith.constant dense<0.000000e+00> : vector<16x128xf32>
    %4 = tpu.matmul %1, %2, %cst {dimension_numbers = #tpu.dot_dimension_numbers<[1], [0], [0], [1], [0, 0, 1, 1], [], []>} : vector<16x16xbf16>, vector<16x128xbf16>, vector<16x128xf32> -> vector<16x128xf32>
    %5 = vector.broadcast %3 : vector<1x128xf32> to vector<16x128xf32>
    %6 = arith.addf %4, %5 : vector<16x128xf32>
    %7 = arith.truncf %6 : vector<16x128xf32> to vector<16x128xbf16>
    %cst_5 = arith.constant 0.000000e+00 : bf16
    %8 = vector.broadcast %cst_5 : bf16 to vector<16x128xbf16>
    %9 = arith.maximumf %7, %8 : vector<16x128xbf16>
    %c0_6 = arith.constant 0 : index
    %c0_7 = arith.constant 0 : index
    %10 = vector.load %arg4[%c0_6, %c0_7] : memref<128x128xbf16, #tpu.memory_space<vmem>>, vector<128x128xbf16>
    %c0_8 = arith.constant 0 : index
    %c0_9 = arith.constant 0 : index
    %11 = vector.load %arg5[%c0_8, %c0_9] : memref<1x128xf32, #tpu.memory_space<vmem>>, vector<1x128xf32>
    %cst_10 = arith.constant dense<0.000000e+00> : vector<16x128xf32>
    %12 = tpu.matmul %9, %10, %cst_10 {dimension_numbers = #tpu.dot_dimension_numbers<[1], [0], [0], [1], [0, 0, 1, 1], [], []>} : vector<16x128xbf16>, vector<128x128xbf16>, vector<16x128xf32> -> vector<16x128xf32>
    %13 = vector.broadcast %11 : vector<1x128xf32> to vector<16x128xf32>
    %14 = arith.addf %12, %13 : vector<16x128xf32>
    %15 = arith.truncf %14 : vector<16x128xf32> to vector<16x128xbf16>
    %cst_11 = arith.constant 0.000000e+00 : bf16
    %16 = vector.broadcast %cst_11 : bf16 to vector<16x128xbf16>
    %17 = arith.maximumf %15, %16 : vector<16x128xbf16>
    %c0_12 = arith.constant 0 : index
    %c0_13 = arith.constant 0 : index
    %18 = vector.load %arg6[%c0_12, %c0_13] : memref<128x128xbf16, #tpu.memory_space<vmem>>, vector<128x128xbf16>
    %c0_14 = arith.constant 0 : index
    %c0_15 = arith.constant 0 : index
    %19 = vector.load %arg7[%c0_14, %c0_15] : memref<1x128xf32, #tpu.memory_space<vmem>>, vector<1x128xf32>
    %cst_16 = arith.constant dense<0.000000e+00> : vector<16x128xf32>
    %20 = tpu.matmul %17, %18, %cst_16 {dimension_numbers = #tpu.dot_dimension_numbers<[1], [0], [0], [1], [0, 0, 1, 1], [], []>} : vector<16x128xbf16>, vector<128x128xbf16>, vector<16x128xf32> -> vector<16x128xf32>
    %21 = vector.broadcast %19 : vector<1x128xf32> to vector<16x128xf32>
    %22 = arith.addf %20, %21 : vector<16x128xf32>
    %23 = arith.negf %22 : vector<16x128xf32>
    %24 = math.exp %23 : vector<16x128xf32>
    %cst_17 = arith.constant 1.000000e+00 : f32
    %25 = vector.broadcast %cst_17 : f32 to vector<16x128xf32>
    %26 = arith.addf %25, %24 : vector<16x128xf32>
    %27 = arith.divf %25, %26 : vector<16x128xf32>
    %28 = arith.truncf %27 : vector<16x128xf32> to vector<16x128xbf16>
    %c0_18 = arith.constant 0 : index
    %c0_19 = arith.constant 0 : index
    %29 = vector.load %arg8[%c0_18, %c0_19] : memref<16x128xbf16, #tpu.memory_space<vmem>>, vector<16x128xbf16>
    tpu.vector_store %arg8[%c0_18, %c0_19], %28 {strides = array<i32>} : memref<16x128xbf16, #tpu.memory_space<vmem>>, vector<16x128xbf16>,
    return
  }
  func.func @transform_0(%arg0: i32) -> (i32, i32) {
    %c0_i32 = arith.constant 0 : i32
    %c0_i32_0 = arith.constant 0 : i32
    return %arg0, %c0_i32 : i32, i32
  }
  func.func @transform_1(%arg0: i32) -> (i32, i32) {
    %c0_i32 = arith.constant 0 : i32
    %c0_i32_0 = arith.constant 0 : i32
    %c0_i32_1 = arith.constant 0 : i32
    return %c0_i32, %c0_i32_0 : i32, i32
  }
  func.func @transform_2(%arg0: i32) -> (i32, i32) {
    %c0_i32 = arith.constant 0 : i32
    %c0_i32_0 = arith.constant 0 : i32
    %c0_i32_1 = arith.constant 0 : i32
    return %c0_i32, %c0_i32_0 : i32, i32
  }
  func.func @transform_3(%arg0: i32) -> (i32, i32) {
    %c0_i32 = arith.constant 0 : i32
    %c0_i32_0 = arith.constant 0 : i32
    %c0_i32_1 = arith.constant 0 : i32
    return %c0_i32, %c0_i32_0 : i32, i32
  }
  func.func @transform_4(%arg0: i32) -> (i32, i32) {
    %c0_i32 = arith.constant 0 : i32
    %c0_i32_0 = arith.constant 0 : i32
    %c0_i32_1 = arith.constant 0 : i32
    return %c0_i32, %c0_i32_0 : i32, i32
  }
  func.func @transform_5(%arg0: i32) -> (i32, i32) {
    %c0_i32 = arith.constant 0 : i32
    %c0_i32_0 = arith.constant 0 : i32
    %c0_i32_1 = arith.constant 0 : i32
    return %c0_i32, %c0_i32_0 : i32, i32
  }
  func.func @transform_6(%arg0: i32) -> (i32, i32) {
    %c0_i32 = arith.constant 0 : i32
    %c0_i32_0 = arith.constant 0 : i32
    %c0_i32_1 = arith.constant 0 : i32
    return %c0_i32, %c0_i32_0 : i32, i32
  }
  func.func @transform_7(%arg0: i32) -> (i32, i32) {
    %c0_i32 = arith.constant 0 : i32
    %c0_i32_0 = arith.constant 0 : i32
    return %arg0, %c0_i32 : i32, i32
  }
}

</mosaic_0001>

<bundles_post_ra>
// kernel: tpu_custom_call.1
= control target key start
LH: loop header
LB: loop body
LE: loop exit
PB: predicated region body
PF: predicated region fallthrough
CT: control target
= control target key end

     0   :  { %12 = vsyncpa [#allocation3], 0  ;;  %s831_s0 = inlined_call_operand.hbm [shape: f32[16,16], index: 0, kind: input, shape index: {}]   ;;  %s832_s1 = inlined_call_operand.hbm [shape: bf16[16,128], index: 1, kind: input, shape index: {}]   ;;  %s833_s2 = inlined_call_operand.vmem [shape: f32[1,128], index: 2, kind: input, shape index: {}]   ;;  %s834_s3 = inlined_call_operand.hbm [shape: bf16[128,128], index: 3, kind: input, shape index: {}]   ;;  %s835_s4 = inlined_call_operand.vmem [shape: f32[1,128], index: 4, kind: input, shape index: {}]   ;;  %s836_s5 = inlined_call_operand.hbm [shape: bf16[128,128], index: 5, kind: input, shape index: {}]   ;;  %s837_s6 = inlined_call_operand.vmem [shape: f32[1,128], index: 6, kind: input, shape index: {}]   ;;  %s838_s7 = inlined_call_operand.hbm [shape: bf16[16,128], index: 7, kind: output, shape index: {}]  }
   0x1   :  { %13 = vsyncpa [#allocation6], 0 }
   0x2   :  { %14 = vsyncpa [#allocation9], 0 }
   0x3   :  { %15 = vsyncpa [#allocation4], 0  ;;  %s668_s24 = smov [#allocation5]   ;;  %s550_s28 = scalar_lea.hbm %s832_s1, 128 }
   0x4   :  { %s33_s25 = sshll.u32 %s668_s24, 4  ;;  %p551_p0 = scmp.ne.s32.totalorder %s832_s1, %s550_s28  ;;  %s34_s25 = int_to_ptr.vmem [resolvable:$true] %s33_s25 }
   0x5   :  { %p554_p1 = scmp.lt.u32.totalorder %s550_s28, %s832_s1 }
   0x7   :  { %p556_p2 = pnand %p554_p1, %p551_p0 }
   0x9   :  { %559 = shalt.err (!%p556_p2)
}
   0xa   :  { %s560_s10 = scalar_lea.vmem %s34_s25, 128  ;;  %p565_p4 = scmp.lt.s32.totalorder %s34_s25, %s34_s25 }
   0xb   :  { %p561_p3 = scmp.ne.s32.totalorder %s34_s25, %s560_s10  ;;  %p566_p5 = scmp.lt.s32.totalorder %s560_s10, %s560_s10 }
   0xd   :  { %p567_p6 = por %p566_p5, %p565_p4 }
   0xf   :  { %p568_p7 = pnand %p567_p6, %p561_p3 }
  0x11   :  { %571 = shalt.err (!%p568_p7)
}
  0x12   :  { %s669_s11 = smov 64   ;;  %s670_s12 = smov 4  }
  0x13   :  { %39 = dma.hbm_to_vmem [thread:$0]  %s832_s1, 128, %s34_s25, [#allocation6], %s669_s11, %s669_s11, %s670_s12  }
  0x14   :  { %s671_s15 = smov [#allocation2]   ;;  %s572_s19 = scalar_lea.hbm %s831_s0, 256 }
  0x15   :  { %s21_s16 = sshll.u32 %s671_s15, 4  ;;  %p573_p8 = scmp.ne.s32.totalorder %s831_s0, %s572_s19  ;;  %s22_s16 = int_to_ptr.vmem [resolvable:$true] %s21_s16 }
  0x16   :  { %p576_p9 = scmp.lt.u32.totalorder %s572_s19, %s831_s0 }
  0x18   :  { %p578_p10 = pnand %p576_p9, %p573_p8 }
  0x1a   :  { %581 = shalt.err (!%p578_p10)
}
  0x1b   :  { %s582_s24 = scalar_lea.vmem %s22_s16, 256  ;;  %p587_p12 = scmp.lt.s32.totalorder %s22_s16, %s22_s16 }
  0x1c   :  { %p583_p11 = scmp.ne.s32.totalorder %s22_s16, %s582_s24  ;;  %p588_p13 = scmp.lt.s32.totalorder %s582_s24, %s582_s24 }
  0x1e   :  { %p589_p0 = por %p588_p13, %p587_p12 }
  0x20   :  { %p590_p1 = pnand %p589_p0, %p583_p11 }
  0x22   :  { %593 = shalt.err (!%p590_p1)
}
  0x23   :  { %s672_s1 = smov 128   ;;  %s673_s25 = smov 8  }
  0x24   :  { %27 = dma.hbm_to_vmem [thread:$0]  %s831_s0, 256, %s22_s16, [#allocation3], %s672_s1, %s672_s1, %s673_s25  }
  0x25   :  { %s674_s28 = smov [#allocation7]   ;;  %s675_s30 = smov [#allocation8]  }
  0x26   :  { %s47_s29 = sshll.u32 %s674_s28, 4  ;;  %s61_s8 = sshll.u32 %s675_s30, 4  ;;  %s48_s29 = int_to_ptr.vmem [resolvable:$true] %s47_s29  ;;  %s747_s8 = int_to_ptr.vmem [resolvable:$true] %s61_s8 }
  0x27   :  { %s594_s13 = scalar_lea.hbm %s834_s3, 1024 }
  0x28   :  { %p595_p2 = scmp.ne.s32.totalorder %s834_s3, %s594_s13  ;;  %p598_p3 = scmp.lt.u32.totalorder %s594_s13, %s834_s3 }
  0x2a   :  { %p600_p4 = pnand %p598_p3, %p595_p2 }
  0x2c   :  { %603 = shalt.err (!%p600_p4)
}
  0x2d   :  { %s604_s0 = scalar_lea.vmem %s48_s29, 1024  ;;  %p609_p6 = scmp.lt.s32.totalorder %s48_s29, %s48_s29 }
  0x2e   :  { %p605_p5 = scmp.ne.s32.totalorder %s48_s29, %s604_s0  ;;  %p610_p7 = scmp.lt.s32.totalorder %s604_s0, %s604_s0 }
  0x30   :  { %p611_p8 = por %p610_p7, %p609_p6 }
  0x32   :  { %p612_p9 = pnand %p611_p8, %p605_p5 }
  0x34   :  { %615 = shalt.err (!%p612_p9)
}
  0x35   :  { %53 = dma.hbm_to_vmem [thread:$0]  %s834_s3, 1024, %s48_s29, [#allocation6], %s669_s11, %s669_s11, %s670_s12  }
  0x36   :  { %s616_s22 = scalar_lea.hbm %s836_s5, 1024 }
  0x37   :  { %p617_p10 = scmp.ne.s32.totalorder %s836_s5, %s616_s22  ;;  %p620_p11 = scmp.lt.u32.totalorder %s616_s22, %s836_s5 }
  0x39   :  { %p622_p12 = pnand %p620_p11, %p617_p10 }
  0x3b   :  { %625 = shalt.err (!%p622_p12)
}
  0x3c   :  { %s626_s26 = scalar_lea.vmem %s747_s8, 1024  ;;  %p631_p0 = scmp.lt.s32.totalorder %s747_s8, %s747_s8 }
  0x3d   :  { %p627_p13 = scmp.ne.s32.totalorder %s747_s8, %s626_s26  ;;  %p632_p1 = scmp.lt.s32.totalorder %s626_s26, %s626_s26 }
  0x3f   :  { %p633_p2 = por %p632_p1, %p631_p0 }
  0x41   :  { %p634_p3 = pnand %p633_p2, %p627_p13 }
  0x43   :  { %637 = shalt.err (!%p634_p3)
}
  0x44   :  { %67 = dma.hbm_to_vmem [thread:$0]  %s836_s5, 1024, %s747_s8, [#allocation9], %s669_s11, %s669_s11, %s670_s12  }
  0x45   :  { %660 = dma.done.wait [#allocation3], 256  }
  0x46   :  { %661 = vsyncadd [#allocation3], 4294967040 }
  0x47   :  { %662 = dma.done.wait [#allocation6], 1152  }
  0x48   :  { %663 = vsyncadd [#allocation6], 4294966144 }
  0x49   :  { %664 = dma.done.wait [#allocation9], 1024  }
  0x4a   :  { %665 = vsyncadd [#allocation9], 4294966272  ;;  %v676_v0 = vmov 0.0   ;;  %vm677_vm0 = vmmov 0   ;;  %v525_v1 = vld [vmem:[#allocation5] sm:$0xff]   ;;  %v83_v2 = vld [vmem:[#allocation2] sm:$0xff] }
  0x4b   :  { %467 = vmatprep.subr.bf16.mxu0 %v676_v0  ;;  %469 = vmatprep.mubr.msk.bf16.mxu0 %vm677_vm0, %v676_v0  ;;  %v84_v3 = vld [vmem:[#allocation2 + $0x8] sm:$0xff]  ;;  %vm101_vm1 = vcmask 130048   ;;  %v526_v5 = vld [vmem:[#allocation7] sm:$0xff]   ;;  %v527_v6 = vld [vmem:[#allocation7 + $0x8] sm:$0xff]   ;;  %v678_v27 = vmov 0  }
  0x4c   :  { %473 = vmatprep.subr.bf16.mxu1 %v676_v0  ;;  %489 = vmatprep.mubr.msk.bf16.mxu1 %vm677_vm0, %v676_v0  ;;  %v85_v4 = vpack.c.bf16 %v84_v3, %v83_v2  ;;  %v528_v7 = vld [vmem:[#allocation7 + $0x10] sm:$0xff]   ;;  %v529_v8 = vld [vmem:[#allocation7 + $0x18] sm:$0xff]   ;;  %v530_v9 = vld [vmem:[#allocation7 + $0x20] sm:$0xff]  }
  0x4d   :  { %468 = vmatpush3.bf16.msra.mxu0 %v525_v1  ;;  %474 = vmatpush3.bf16.msra.mxu1 %v526_v5  ;;  %v531_v10 = vld [vmem:[#allocation7 + $0x28] sm:$0xff]   ;;  %v532_v11 = vld [vmem:[#allocation7 + $0x30] sm:$0xff]   ;;  %v533_v12 = vld [vmem:[#allocation7 + $0x38] sm:$0xff]  }
  0x4e   :  { %493 = vmatprep.subr.bf16.mxu0 %v676_v0  ;;  %475 = vmatprep.subr.bf16.mxu1 %v676_v0  ;;  %v534_v13 = vld [vmem:[#allocation8] sm:$0xff]   ;;  %v535_v14 = vld [vmem:[#allocation8 + $0x8] sm:$0xff]   ;;  %v536_v15 = vld [vmem:[#allocation8 + $0x10] sm:$0xff]  }
  0x4f   :  { %v537_v16 = vld [vmem:[#allocation8 + $0x18] sm:$0xff]   ;;  %v538_v17 = vld [vmem:[#allocation8 + $0x20] sm:$0xff]   ;;  %v539_v18 = vld [vmem:[#allocation8 + $0x28] sm:$0xff]  }
  0x50   :  { %470 = vmatmul.mubr.msk.bf16.vlgmr.msra.gmra.mrb[0].mxu0 %vm101_vm1, %v85_v4  ;;  %v415_v19 = vld [vmem:[%s833_s2] ss:$0 sm:$0xff]  ;;  %v540_v29 = vld [vmem:[#allocation8 + $0x30] sm:$0xff]   ;;  %v541_v30 = vld [vmem:[#allocation8 + $0x38] sm:$0xff]  }
  0x51   :  { %509 = vmatprep.mubr.msk.bf16.mxu0 %vm677_vm0, %v676_v0  ;;  %476 = vmatpush3.bf16.msra.mxu1 %v527_v6  ;;  %v418_v31 = vld [vmem:[%s835_s4] ss:$0 sm:$0xff]  ;;  %s679_s4 = smov [#allocation10]  }
  0x52   :  { %477 = vmatprep.subr.bf16.mxu1 %v676_v0  ;;  %494 = vmatpush3.bf16.msra.mxu0 %v534_v13  ;;  %v427_v40 = vld [vmem:[%s837_s6] ss:$0 sm:$0xff]  ;;  %s401_s9 = sshll.u32 %s679_s4, 4  ;;  %s402_s9 = int_to_ptr.vmem [resolvable:$true] %s401_s9 }
  0x53   :  { %495 = vmatprep.subr.bf16.mxu0 %v676_v0  ;;  %s638_s6 = scalar_lea.vmem %s402_s9, 128  ;;  %p643_p5 = scmp.lt.s32.totalorder %s402_s9, %s402_s9 }
  0x54   :  { %p639_p4 = scmp.ne.s32.totalorder %s402_s9, %s638_s6  ;;  %p644_p6 = scmp.lt.s32.totalorder %s638_s6, %s638_s6 }
  0x55   :  { %478 = vmatpush3.bf16.msra.mxu1 %v528_v7 }
  0x56   :  { %479 = vmatprep.subr.bf16.mxu1 %v676_v0  ;;  %496 = vmatpush3.bf16.msra.mxu0 %v535_v14  ;;  %p645_p7 = por %p644_p6, %p643_p5 }
  0x57   :  { %497 = vmatprep.subr.bf16.mxu0 %v676_v0 }
  0x58   :  { %p646_p8 = pnand %p645_p7, %p639_p4 }
  0x59   :  { %480 = vmatpush3.bf16.msra.mxu1 %v529_v8 }
  0x5a   :  { %481 = vmatprep.subr.bf16.mxu1 %v676_v0  ;;  %498 = vmatpush3.bf16.msra.mxu0 %v536_v15 }
  0x5b   :  { %499 = vmatprep.subr.bf16.mxu0 %v676_v0 }
  0x5d   :  { %482 = vmatpush3.bf16.msra.mxu1 %v530_v9 }
  0x5e   :  { %483 = vmatprep.subr.bf16.mxu1 %v676_v0  ;;  %500 = vmatpush3.bf16.msra.mxu0 %v537_v16 }
  0x5f   :  { %501 = vmatprep.subr.bf16.mxu0 %v676_v0 }
  0x61   :  { %484 = vmatpush3.bf16.msra.mxu1 %v531_v10 }
  0x62   :  { %485 = vmatprep.subr.bf16.mxu1 %v676_v0  ;;  %502 = vmatpush3.bf16.msra.mxu0 %v538_v17 }
  0x63   :  { %503 = vmatprep.subr.bf16.mxu0 %v676_v0 }
  0x65   :  { %486 = vmatpush3.bf16.msra.mxu1 %v532_v11 }
  0x66   :  { %487 = vmatprep.subr.bf16.mxu1 %v676_v0  ;;  %504 = vmatpush3.bf16.msra.mxu0 %v539_v18 }
  0x67   :  { %505 = vmatprep.subr.bf16.mxu0 %v676_v0 }
  0x69   :  { %488 = vmatpush3.bf16.msra.mxu1 %v533_v12 }
  0x6a   :  { %506 = vmatpush3.bf16.msra.mxu0 %v540_v29 }
  0x6b   :  { %507 = vmatprep.subr.bf16.mxu0 %v676_v0 }
  0x6e   :  { %508 = vmatpush3.bf16.msra.mxu0 %v541_v30 }
 0x123   :  { %v139_v20 = vpop.f32.mrb[0].mxu0 }
 0x124   :  { %v471_v21 = vpop.f32.mrb[1].mxu0  ;;  %v140_v23 = vadd.f32 %v415_v19, %v139_v20 }
 0x125   :  { %v142_v22 = vpop.f32.mrb[2].mxu0 }
 0x126   :  { %v143_v24 = vadd.f32 %v415_v19, %v142_v22  ;;  %v472_v25 = vpop.f32.mrb[3].mxu0 }
 0x128   :  { %v146_v26 = vpack.c.bf16 %v143_v24, %v140_v23 }
 0x12a   :  { %v147_v28 = vmax.bf16 %v678_v27, %v146_v26 }
 0x12c   :  { %490 = vmatmul.mubr.bf16.vlgmr.msra.gmra.mrb[0].mxu1 %v147_v28 }
 0x1ff   :  { %v253_v32 = vpop.f32.mrb[0].mxu1 }
 0x200   :  { %v491_v33 = vpop.f32.mrb[1].mxu1  ;;  %v254_v35 = vadd.f32 %v418_v31, %v253_v32 }
 0x201   :  { %v256_v34 = vpop.f32.mrb[2].mxu1 }
 0x202   :  { %v257_v36 = vadd.f32 %v418_v31, %v256_v34  ;;  %v492_v37 = vpop.f32.mrb[3].mxu1 }
 0x204   :  { %v260_v38 = vpack.c.bf16 %v257_v36, %v254_v35 }
 0x206   :  { %v261_v39 = vmax.bf16 %v678_v27, %v260_v38 }
 0x208   :  { %510 = vmatmul.mubr.bf16.vlgmr.msra.gmra.mrb[4].mxu0 %v261_v39 }
 0x2db   :  { %v367_v41 = vpop.f32.mrb[4].mxu0 }
 0x2dc   :  { %v368_v42 = vadd.f32 %v427_v40, %v367_v41  ;;  %v511_v43 = vpop.f32.mrb[5].mxu0 }
 0x2dd   :  { %v370_v44 = vpop.f32.mrb[6].mxu0 }
 0x2de   :  { %v436_v45 = vmul.f32 -1.442695, %v368_v42  ;;  %v371_v46 = vadd.f32 %v427_v40, %v370_v44  ;;  %v512_v47 = vpop.f32.mrb[7].mxu0 }
 0x2e0   :  { %542 = vpow2.f32 %v436_v45  ;;  %v437_v48 = vmul.f32 -1.442695, %v371_v46 }
 0x2e2   :  { %544 = vpow2.f32 %v437_v48 }
 0x2ea   :  { %v543_v49 = vpop.eup %542 }
 0x2eb   :  { %v380_v50 = vadd.f32 1.0, %v543_v49 }
 0x2ec   :  { %v545_v51 = vpop.eup %544 }
 0x2ed   :  { %v381_v52 = vadd.f32 1.0, %v545_v51  ;;  %546 = vrcp.f32 %v380_v50 }
 0x2ef   :  { %548 = vrcp.f32 %v381_v52 }
 0x2f7   :  { %v547_v53 = vpop.eup %546 }
 0x2f9   :  { %v549_v54 = vpop.eup %548 }
 0x2fa   :  { %v445_v55 = vpack.c.bf16 %v549_v54, %v547_v53 }
 0x2fc   :  { %446 = vst [vmem:[#allocation10] sm:$0xff] %v445_v55  }
 0x2fd   :  { %649 = shalt.err (!%p646_p8)
}
 0x2fe   :  { %s650_s14 = scalar_lea.hbm %s838_s7, 128 }
 0x2ff   :  { %p651_p9 = scmp.ne.s32.totalorder %s838_s7, %s650_s14  ;;  %p654_p10 = scmp.lt.u32.totalorder %s650_s14, %s838_s7 }
 0x301   :  { %p656_p11 = pnand %p654_p10, %p651_p9 }
 0x303   :  { %659 = shalt.err (!%p656_p11)
}
 0x304   :  { %407 = dma.vmem_to_hbm [thread:$0]  %s402_s9, 128, %s838_s7, [#allocation4], %s669_s11, %s669_s11, %s670_s12  }
 0x305   :  { %666 = dma.done.wait [#allocation4], 128  }
 0x306   :  { %667 = vsyncadd [#allocation4], 4294967168 }
 0x307   :  { %411 = vsyncpa [#allocation3], 1 }
 0x308   :  { %412 = vsyncpa [#allocation6], 1 }
 0x309   :  { %413 = vsyncpa [#allocation9], 1 }
 0x30a   :  { %414 = vsyncpa [#allocation4], 1 }

// kernel: tpu_custom_call.1
= control target key start
LH: loop header
LB: loop body
LE: loop exit
PB: predicated region body
PF: predicated region fallthrough
CT: control target
= control target key end

     0   :  { %12 = vsyncpa [#allocation3], 0  ;;  %s831_s0 = inlined_call_operand.hbm [shape: f32[16,16], index: 0, kind: input, shape index: {}]   ;;  %s832_s1 = inlined_call_operand.hbm [shape: bf16[16,128], index: 1, kind: input, shape index: {}]   ;;  %s833_s2 = inlined_call_operand.vmem [shape: f32[1,128], index: 2, kind: input, shape index: {}]   ;;  %s834_s3 = inlined_call_operand.hbm [shape: bf16[128,128], index: 3, kind: input, shape index: {}]   ;;  %s835_s4 = inlined_call_operand.vmem [shape: f32[1,128], index: 4, kind: input, shape index: {}]   ;;  %s836_s5 = inlined_call_operand.hbm [shape: bf16[128,128], index: 5, kind: input, shape index: {}]   ;;  %s837_s6 = inlined_call_operand.vmem [shape: f32[1,128], index: 6, kind: input, shape index: {}]   ;;  %s838_s7 = inlined_call_operand.hbm [shape: bf16[16,128], index: 7, kind: output, shape index: {}]  }
   0x1   :  { %13 = vsyncpa [#allocation6], 0 }
   0x2   :  { %14 = vsyncpa [#allocation9], 0 }
   0x3   :  { %15 = vsyncpa [#allocation4], 0  ;;  %s668_s24 = smov [#allocation5]   ;;  %s550_s28 = scalar_lea.hbm %s832_s1, 128 }
   0x4   :  { %s33_s25 = sshll.u32 %s668_s24, 4  ;;  %p551_p0 = scmp.ne.s32.totalorder %s832_s1, %s550_s28  ;;  %s34_s25 = int_to_ptr.vmem [resolvable:$true] %s33_s25 }
   0x5   :  { %p554_p1 = scmp.lt.u32.totalorder %s550_s28, %s832_s1 }
   0x7   :  { %p556_p2 = pnand %p554_p1, %p551_p0 }
   0x9   :  { %559 = shalt.err (!%p556_p2)
}
   0xa   :  { %s560_s10 = scalar_lea.vmem %s34_s25, 128  ;;  %p565_p4 = scmp.lt.s32.totalorder %s34_s25, %s34_s25 }
   0xb   :  { %p561_p3 = scmp.ne.s32.totalorder %s34_s25, %s560_s10  ;;  %p566_p5 = scmp.lt.s32.totalorder %s560_s10, %s560_s10 }
   0xd   :  { %p567_p6 = por %p566_p5, %p565_p4 }
   0xf   :  { %p568_p7 = pnand %p567_p6, %p561_p3 }
  0x11   :  { %571 = shalt.err (!%p568_p7)
}
  0x12   :  { %s669_s11 = smov 64   ;;  %s670_s12 = smov 4  }
  0x13   :  { %39 = dma.hbm_to_vmem [thread:$0]  %s832_s1, 128, %s34_s25, [#allocation6], %s669_s11, %s669_s11, %s670_s12  }
  0x14   :  { %s671_s15 = smov [#allocation2]   ;;  %s572_s19 = scalar_lea.hbm %s831_s0, 256 }
  0x15   :  { %s21_s16 = sshll.u32 %s671_s15, 4  ;;  %p573_p8 = scmp.ne.s32.totalorder %s831_s0, %s572_s19  ;;  %s22_s16 = int_to_ptr.vmem [resolvable:$true] %s21_s16 }
  0x16   :  { %p576_p9 = scmp.lt.u32.totalorder %s572_s19, %s831_s0 }
  0x18   :  { %p578_p10 = pnand %p576_p9, %p573_p8 }
  0x1a   :  { %581 = shalt.err (!%p578_p10)
}
  0x1b   :  { %s582_s24 = scalar_lea.vmem %s22_s16, 256  ;;  %p587_p12 = scmp.lt.s32.totalorder %s22_s16, %s22_s16 }
  0x1c   :  { %p583_p11 = scmp.ne.s32.totalorder %s22_s16, %s582_s24  ;;  %p588_p13 = scmp.lt.s32.totalorder %s582_s24, %s582_s24 }
  0x1e   :  { %p589_p0 = por %p588_p13, %p587_p12 }
  0x20   :  { %p590_p1 = pnand %p589_p0, %p583_p11 }
  0x22   :  { %593 = shalt.err (!%p590_p1)
}
  0x23   :  { %s672_s1 = smov 128   ;;  %s673_s25 = smov 8  }
  0x24   :  { %27 = dma.hbm_to_vmem [thread:$0]  %s831_s0, 256, %s22_s16, [#allocation3], %s672_s1, %s672_s1, %s673_s25  }
  0x25   :  { %s674_s28 = smov [#allocation7]   ;;  %s675_s30 = smov [#allocation8]  }
  0x26   :  { %s47_s29 = sshll.u32 %s674_s28, 4  ;;  %s61_s8 = sshll.u32 %s675_s30, 4  ;;  %s48_s29 = int_to_ptr.vmem [resolvable:$true] %s47_s29  ;;  %s747_s8 = int_to_ptr.vmem [resolvable:$true] %s61_s8 }
  0x27   :  { %s594_s13 = scalar_lea.hbm %s834_s3, 1024 }
  0x28   :  { %p595_p2 = scmp.ne.s32.totalorder %s834_s3, %s594_s13  ;;  %p598_p3 = scmp.lt.u32.totalorder %s594_s13, %s834_s3 }
  0x2a   :  { %p600_p4 = pnand %p598_p3, %p595_p2 }
  0x2c   :  { %603 = shalt.err (!%p600_p4)
}
  0x2d   :  { %s604_s0 = scalar_lea.vmem %s48_s29, 1024  ;;  %p609_p6 = scmp.lt.s32.totalorder %s48_s29, %s48_s29 }
  0x2e   :  { %p605_p5 = scmp.ne.s32.totalorder %s48_s29, %s604_s0  ;;  %p610_p7 = scmp.lt.s32.totalorder %s604_s0, %s604_s0 }
  0x30   :  { %p611_p8 = por %p610_p7, %p609_p6 }
  0x32   :  { %p612_p9 = pnand %p611_p8, %p605_p5 }
  0x34   :  { %615 = shalt.err (!%p612_p9)
}
  0x35   :  { %53 = dma.hbm_to_vmem [thread:$0]  %s834_s3, 1024, %s48_s29, [#allocation6], %s669_s11, %s669_s11, %s670_s12  }
  0x36   :  { %s616_s22 = scalar_lea.hbm %s836_s5, 1024 }
  0x37   :  { %p617_p10 = scmp.ne.s32.totalorder %s836_s5, %s616_s22  ;;  %p620_p11 = scmp.lt.u32.totalorder %s616_s22, %s836_s5 }
  0x39   :  { %p622_p12 = pnand %p620_p11, %p617_p10 }
  0x3b   :  { %625 = shalt.err (!%p622_p12)
}
  0x3c   :  { %s626_s26 = scalar_lea.vmem %s747_s8, 1024  ;;  %p631_p0 = scmp.lt.s32.totalorder %s747_s8, %s747_s8 }
  0x3d   :  { %p627_p13 = scmp.ne.s32.totalorder %s747_s8, %s626_s26  ;;  %p632_p1 = scmp.lt.s32.totalorder %s626_s26, %s626_s26 }
  0x3f   :  { %p633_p2 = por %p632_p1, %p631_p0 }
  0x41   :  { %p634_p3 = pnand %p633_p2, %p627_p13 }
  0x43   :  { %637 = shalt.err (!%p634_p3)
}
  0x44   :  { %67 = dma.hbm_to_vmem [thread:$0]  %s836_s5, 1024, %s747_s8, [#allocation9], %s669_s11, %s669_s11, %s670_s12  }
  0x45   :  { %660 = dma.done.wait [#allocation3], 256  }
  0x46   :  { %661 = vsyncadd [#allocation3], 4294967040 }
  0x47   :  { %662 = dma.done.wait [#allocation6], 1152  }
  0x48   :  { %663 = vsyncadd [#allocation6], 4294966144 }
  0x49   :  { %664 = dma.done.wait [#allocation9], 1024  }
  0x4a   :  { %665 = vsyncadd [#allocation9], 4294966272  ;;  %v676_v0 = vmov 0.0   ;;  %vm677_vm0 = vmmov 0   ;;  %v525_v1 = vld [vmem:[#allocation5] sm:$0xff]   ;;  %v83_v2 = vld [vmem:[#allocation2] sm:$0xff] }
  0x4b   :  { %467 = vmatprep.subr.bf16.mxu0 %v676_v0  ;;  %469 = vmatprep.mubr.msk.bf16.mxu0 %vm677_vm0, %v676_v0  ;;  %v84_v3 = vld [vmem:[#allocation2 + $0x8] sm:$0xff]  ;;  %vm101_vm1 = vcmask 130048   ;;  %v526_v5 = vld [vmem:[#allocation7] sm:$0xff]   ;;  %v527_v6 = vld [vmem:[#allocation7 + $0x8] sm:$0xff]   ;;  %v678_v27 = vmov 0  }
  0x4c   :  { %473 = vmatprep.subr.bf16.mxu1 %v676_v0  ;;  %489 = vmatprep.mubr.msk.bf16.mxu1 %vm677_vm0, %v676_v0  ;;  %v85_v4 = vpack.c.bf16 %v84_v3, %v83_v2  ;;  %v528_v7 = vld [vmem:[#allocation7 + $0x10] sm:$0xff]   ;;  %v529_v8 = vld [vmem:[#allocation7 + $0x18] sm:$0xff]   ;;  %v530_v9 = vld [vmem:[#allocation7 + $0x20] sm:$0xff]  }
  0x4d   :  { %468 = vmatpush3.bf16.msra.mxu0 %v525_v1  ;;  %474 = vmatpush3.bf16.msra.mxu1 %v526_v5  ;;  %v531_v10 = vld [vmem:[#allocation7 + $0x28] sm:$0xff]   ;;  %v532_v11 = vld [vmem:[#allocation7 + $0x30] sm:$0xff]   ;;  %v533_v12 = vld [vmem:[#allocation7 + $0x38] sm:$0xff]  }
  0x4e   :  { %493 = vmatprep.subr.bf16.mxu0 %v676_v0  ;;  %475 = vmatprep.subr.bf16.mxu1 %v676_v0  ;;  %v534_v13 = vld [vmem:[#allocation8] sm:$0xff]   ;;  %v535_v14 = vld [vmem:[#allocation8 + $0x8] sm:$0xff]   ;;  %v536_v15 = vld [vmem:[#allocation8 + $0x10] sm:$0xff]  }
  0x4f   :  { %v537_v16 = vld [vmem:[#allocation8 + $0x18] sm:$0xff]   ;;  %v538_v17 = vld [vmem:[#allocation8 + $0x20] sm:$0xff]   ;;  %v539_v18 = vld [vmem:[#allocation8 + $0x28] sm:$0xff]  }
  0x50   :  { %470 = vmatmul.mubr.msk.bf16.vlgmr.msra.gmra.mrb[0].mxu0 %vm101_vm1, %v85_v4  ;;  %v415_v19 = vld [vmem:[%s833_s2] ss:$0 sm:$0xff]  ;;  %v540_v29 = vld [vmem:[#allocation8 + $0x30] sm:$0xff]   ;;  %v541_v30 = vld [vmem:[#allocation8 + $0x38] sm:$0xff]  }
  0x51   :  { %509 = vmatprep.mubr.msk.bf16.mxu0 %vm677_vm0, %v676_v0  ;;  %476 = vmatpush3.bf16.msra.mxu1 %v527_v6  ;;  %v418_v31 = vld [vmem:[%s835_s4] ss:$0 sm:$0xff]  ;;  %s679_s4 = smov [#allocation10]  }
  0x52   :  { %477 = vmatprep.subr.bf16.mxu1 %v676_v0  ;;  %494 = vmatpush3.bf16.msra.mxu0 %v534_v13  ;;  %v427_v40 = vld [vmem:[%s837_s6] ss:$0 sm:$0xff]  ;;  %s401_s9 = sshll.u32 %s679_s4, 4  ;;  %s402_s9 = int_to_ptr.vmem [resolvable:$true] %s401_s9 }
  0x53   :  { %495 = vmatprep.subr.bf16.mxu0 %v676_v0  ;;  %s638_s6 = scalar_lea.vmem %s402_s9, 128  ;;  %p643_p5 = scmp.lt.s32.totalorder %s402_s9, %s402_s9 }
  0x54   :  { %p639_p4 = scmp.ne.s32.totalorder %s402_s9, %s638_s6  ;;  %p644_p6 = scmp.lt.s32.totalorder %s638_s6, %s638_s6 }
  0x55   :  { %478 = vmatpush3.bf16.msra.mxu1 %v528_v7 }
  0x56   :  { %479 = vmatprep.subr.bf16.mxu1 %v676_v0  ;;  %496 = vmatpush3.bf16.msra.mxu0 %v535_v14  ;;  %p645_p7 = por %p644_p6, %p643_p5 }
  0x57   :  { %497 = vmatprep.subr.bf16.mxu0 %v676_v0 }
  0x58   :  { %p646_p8 = pnand %p645_p7, %p639_p4 }
  0x59   :  { %480 = vmatpush3.bf16.msra.mxu1 %v529_v8 }
  0x5a   :  { %481 = vmatprep.subr.bf16.mxu1 %v676_v0  ;;  %498 = vmatpush3.bf16.msra.mxu0 %v536_v15 }
  0x5b   :  { %499 = vmatprep.subr.bf16.mxu0 %v676_v0 }
  0x5d   :  { %482 = vmatpush3.bf16.msra.mxu1 %v530_v9 }
  0x5e   :  { %483 = vmatprep.subr.bf16.mxu1 %v676_v0  ;;  %500 = vmatpush3.bf16.msra.mxu0 %v537_v16 }
  0x5f   :  { %501 = vmatprep.subr.bf16.mxu0 %v676_v0 }
  0x61   :  { %484 = vmatpush3.bf16.msra.mxu1 %v531_v10 }
  0x62   :  { %485 = vmatprep.subr.bf16.mxu1 %v676_v0  ;;  %502 = vmatpush3.bf16.msra.mxu0 %v538_v17 }
  0x63   :  { %503 = vmatprep.subr.bf16.mxu0 %v676_v0 }
  0x65   :  { %486 = vmatpush3.bf16.msra.mxu1 %v532_v11 }
  0x66   :  { %487 = vmatprep.subr.bf16.mxu1 %v676_v0  ;;  %504 = vmatpush3.bf16.msra.mxu0 %v539_v18 }
  0x67   :  { %505 = vmatprep.subr.bf16.mxu0 %v676_v0 }
  0x69   :  { %488 = vmatpush3.bf16.msra.mxu1 %v533_v12 }
  0x6a   :  { %506 = vmatpush3.bf16.msra.mxu0 %v540_v29 }
  0x6b   :  { %507 = vmatprep.subr.bf16.mxu0 %v676_v0 }
  0x6e   :  { %508 = vmatpush3.bf16.msra.mxu0 %v541_v30 }
 0x123   :  { %v139_v20 = vpop.f32.mrb[0].mxu0 }
 0x124   :  { %v471_v21 = vpop.f32.mrb[1].mxu0  ;;  %v140_v23 = vadd.f32 %v415_v19, %v139_v20 }
 0x125   :  { %v142_v22 = vpop.f32.mrb[2].mxu0 }
 0x126   :  { %v143_v24 = vadd.f32 %v415_v19, %v142_v22  ;;  %v472_v25 = vpop.f32.mrb[3].mxu0 }
 0x128   :  { %v146_v26 = vpack.c.bf16 %v143_v24, %v140_v23 }
 0x12a   :  { %v147_v28 = vmax.bf16 %v678_v27, %v146_v26 }
 0x12c   :  { %490 = vmatmul.mubr.bf16.vlgmr.msra.gmra.mrb[0].mxu1 %v147_v28 }
 0x1ff   :  { %v253_v32 = vpop.f32.mrb[0].mxu1 }
 0x200   :  { %v491_v33 = vpop.f32.mrb[1].mxu1  ;;  %v254_v35 = vadd.f32 %v418_v31, %v253_v32 }
 0x201   :  { %v256_v34 = vpop.f32.mrb[2].mxu1 }
 0x202   :  { %v257_v36 = vadd.f32 %v418_v31, %v256_v34  ;;  %v492_v37 = vpop.f32.mrb[3].mxu1 }
 0x204   :  { %v260_v38 = vpack.c.bf16 %v257_v36, %v254_v35 }
 0x206   :  { %v261_v39 = vmax.bf16 %v678_v27, %v260_v38 }
 0x208   :  { %510 = vmatmul.mubr.bf16.vlgmr.msra.gmra.mrb[4].mxu0 %v261_v39 }
 0x2db   :  { %v367_v41 = vpop.f32.mrb[4].mxu0 }
 0x2dc   :  { %v368_v42 = vadd.f32 %v427_v40, %v367_v41  ;;  %v511_v43 = vpop.f32.mrb[5].mxu0 }
 0x2dd   :  { %v370_v44 = vpop.f32.mrb[6].mxu0 }
 0x2de   :  { %v436_v45 = vmul.f32 -1.442695, %v368_v42  ;;  %v371_v46 = vadd.f32 %v427_v40, %v370_v44  ;;  %v512_v47 = vpop.f32.mrb[7].mxu0 }
 0x2e0   :  { %542 = vpow2.f32 %v436_v45  ;;  %v437_v48 = vmul.f32 -1.442695, %v371_v46 }
 0x2e2   :  { %544 = vpow2.f32 %v437_v48 }
 0x2ea   :  { %v543_v49 = vpop.eup %542 }
 0x2eb   :  { %v380_v50 = vadd.f32 1.0, %v543_v49 }
 0x2ec   :  { %v545_v51 = vpop.eup %544 }
 0x2ed   :  { %v381_v52 = vadd.f32 1.0, %v545_v51  ;;  %546 = vrcp.f32 %v380_v50 }
 0x2ef   :  { %548 = vrcp.f32 %v381_v52 }
 0x2f7   :  { %v547_v53 = vpop.eup %546 }
 0x2f9   :  { %v549_v54 = vpop.eup %548 }
 0x2fa   :  { %v445_v55 = vpack.c.bf16 %v549_v54, %v547_v53 }
 0x2fc   :  { %446 = vst [vmem:[#allocation10] sm:$0xff] %v445_v55  }
 0x2fd   :  { %649 = shalt.err (!%p646_p8)
}
 0x2fe   :  { %s650_s14 = scalar_lea.hbm %s838_s7, 128 }
 0x2ff   :  { %p651_p9 = scmp.ne.s32.totalorder %s838_s7, %s650_s14  ;;  %p654_p10 = scmp.lt.u32.totalorder %s650_s14, %s838_s7 }
 0x301   :  { %p656_p11 = pnand %p654_p10, %p651_p9 }
 0x303   :  { %659 = shalt.err (!%p656_p11)
}
 0x304   :  { %407 = dma.vmem_to_hbm [thread:$0]  %s402_s9, 128, %s838_s7, [#allocation4], %s669_s11, %s669_s11, %s670_s12  }
 0x305   :  { %666 = dma.done.wait [#allocation4], 128  }
 0x306   :  { %667 = vsyncadd [#allocation4], 4294967168 }
 0x307   :  { %411 = vsyncpa [#allocation3], 1 }
 0x308   :  { %412 = vsyncpa [#allocation6], 1 }
 0x309   :  { %413 = vsyncpa [#allocation9], 1 }
 0x30a   :  { %414 = vsyncpa [#allocation4], 1 }

</bundles_post_ra>
